<compile_context>
chip_gen: v6e
topology: v6e:2x2x1
jax: 0.10.0
libtpu: 0.0.40
codegen_flags: <defaults>
</compile_context>

<pallas_src>
import functools

import jax
import jax.numpy as jnp
from jax import lax
from jax.experimental import pallas as pl
from jax.experimental.pallas import tpu as pltpu


def _mlp_kernel(num_layers, chunk, x_ref, *refs):
    """Fused MLP on one batch tile.

    x_ref:   [tile_n, d_in]   (batch on sublanes, natural layout)
    refs:    (w0, b0, ..., w_{L-1}, b_{L-1}, out_ref)
             w_i: [d_in_i, d_out_i]  (pre-transposed in the wrapper)
             b_i: [1, d_out_i]
    out_ref: [tile_n, d_out]
    """
    out_ref = refs[-1]
    param_refs = refs[:-1]
    tile_n = x_ref.shape[0]

    # Weights/biases are tiny and resident (constant index maps): load once and
    # reuse across all sub-chunks.  Bias is kept in f32 for the accumulator add.
    w_list = [param_refs[2 * i][...] for i in range(num_layers)]
    b_list = [param_refs[2 * i + 1][...].astype(jnp.float32)
              for i in range(num_layers)]
    act_dtype = w_list[0].dtype  # bf16 path feeds the MXU in bf16 between layers

    def run_chunk(start, size):
        h = x_ref[pl.ds(start, size), :]                       # [size, d_in]
        for i in range(num_layers):
            # f32 accumulation on the MXU regardless of operand dtype.
            h = jnp.dot(h, w_list[i], preferred_element_type=jnp.float32)
            h = h + b_list[i]                                  # bias-add in f32
            if i < num_layers - 1:
                h = jnp.maximum(h, 0.0)                        # ReLU in f32
                h = h.astype(act_dtype)                        # back to MXU dtype
        out_ref[pl.ds(start, size), :] = h.astype(out_ref.dtype)

    num_full = tile_n // chunk
    rem = tile_n - num_full * chunk

    # Inner chunk loop: all layers per sub-chunk keeps the working set small
    # and frees vld/vst slots for the HBM pipeline.
    def body(c, carry):
        run_chunk(pl.multiple_of(c * chunk, chunk), chunk)
        return carry

    lax.fori_loop(0, num_full, body, 0, unroll=True)

    if rem:                                                    # static tail chunk
        run_chunk(num_full * chunk, rem)


def small_dense_phi(x, weights, biases, *, batch_tile=8192, inner_chunk=512,
                    min_grid_steps=8):
    """Fused MLP forward, natural layout.

    x:          [N, widths[0]]
    weights[i]: [widths[i+1], widths[i]]   (PyTorch nn.Linear layout)
    biases[i]:  [widths[i+1]] (or [widths[i+1], 1])
    returns:    [N, widths[-1]]  (dtype of x)
    """
    n, d_in = x.shape
    num_layers = len(weights)
    d_out = weights[-1].shape[0]

    # Tiny one-time param relayout (a few KiB): weights -> [d_in, d_out],
    # biases -> [1, d_out] rows.  The big x / out tensors are NOT touched.
    w_t = [w.T for w in weights]
    b_r = [b.reshape(1, -1) for b in biases]

    # Batch tile: as big as possible, but clamped so large N still gets
    # >= min_grid_steps grid steps (pipelining + v7x dual-TC sharding).
    if n <= batch_tile:
        tile_n = n                               # single block == full extent
    else:
        t = (n // min_grid_steps) // 128 * 128   # lane/sublane-friendly multiple of 128
        tile_n = max(128, min(batch_tile, t))
    chunk = min(inner_chunk, tile_n)

    grid = (pl.cdiv(n, tile_n),)                 # ragged last block handled by Pallas

    # TODO(synk): if xprof shows exposed DMA on the x stream at production N,
    # add pipeline_mode=pl.Buffered(3) on the x BlockSpec only.
    in_specs = [pl.BlockSpec((tile_n, d_in), lambda i: (i, 0))]
    for wt, br in zip(w_t, b_r):
        in_specs.append(pl.BlockSpec(wt.shape, lambda i: (0, 0)))
        in_specs.append(pl.BlockSpec(br.shape, lambda i: (0, 0)))
    out_spec = pl.BlockSpec((tile_n, d_out), lambda i: (i, 0))

    flat_params = []
    for wt, br in zip(w_t, b_r):
        flat_params.extend([wt, br])

    kernel = functools.partial(_mlp_kernel, num_layers, chunk)

    return pl.pallas_call(
        kernel,
        out_shape=jax.ShapeDtypeStruct((n, d_out), x.dtype),
        grid_spec=pltpu.PrefetchScalarGridSpec(
            num_scalar_prefetch=0,
            grid=grid,
            in_specs=in_specs,
            out_specs=out_spec,
        ),
        compiler_params=pltpu.CompilerParams(
            dimension_semantics=("parallel",),
            vmem_limit_bytes=48 << 20,  # headroom for big f32 tiles (v5e default 16 MiB)
        ),
    )(x, *flat_params)


def init_params(widths, key):
    """torch.nn.Linear default init: U(-1/sqrt(fan_in), 1/sqrt(fan_in)).
    Weights in PyTorch layout [out, in]; biases as [out]."""
    weights, biases = [], []
    for i in range(len(widths) - 1):
        fan_in, fan_out = widths[i], widths[i + 1]
        key, kw, kb = jax.random.split(key, 3)
        bound = 1.0 / (fan_in ** 0.5)
        weights.append(jax.random.uniform(kw, (fan_out, fan_in), jnp.float32,
                                          -bound, bound))
        biases.append(jax.random.uniform(kb, (fan_out,), jnp.float32,
                                         -bound, bound))
    return weights, biases


def reference_mlp(x, weights, biases):
    h = x.astype(jnp.float32)
    for i, (w, b) in enumerate(zip(weights, biases)):
        h = h @ w.T.astype(jnp.float32) + b.reshape(1, -1).astype(jnp.float32)
        if i < len(weights) - 1:
            h = jnp.maximum(h, 0.0)
    return h


if __name__ == "__main__":
    widths = [32, 64, 48, 16]                     # SmallDensePhi(widths)

    key = jax.random.PRNGKey(0)
    key, kparam = jax.random.split(key)
    weights, biases = init_params(widths, kparam)

    # 1) f32, tiny batch: single full-extent tile.
    key, k1 = jax.random.split(key)
    x_small = jax.random.normal(k1, (16, widths[0]), jnp.float32)
    out_small = jax.block_until_ready(small_dense_phi(x_small, weights, biases))
    ref_small = reference_mlp(x_small, weights, biases)
    assert out_small.shape == (16, widths[-1])
    assert jnp.allclose(out_small, ref_small, atol=1e-3, rtol=1e-3), \
        f"max abs diff {jnp.max(jnp.abs(out_small - ref_small))}"

    # 2) f32, N=1000 with the default (large) tile: single tile, exercises the
    #    static tail chunk (1000 = 512 + 488) of the inner loop.
    key, k2 = jax.random.split(key)
    x_big = jax.random.normal(k2, (1000, widths[0]), jnp.float32)
    ref_big = reference_mlp(x_big, weights, biases)
    out_big = jax.block_until_ready(small_dense_phi(x_big, weights, biases))
    assert out_big.shape == (1000, widths[-1])
    assert jnp.allclose(out_big, ref_big, atol=1e-3, rtol=1e-3), \
        f"max abs diff {jnp.max(jnp.abs(out_big - ref_big))}"

    # 3) f32, small batch_tile: multi-step grid (8 steps) with a masked partial
    #    last block (1000 = 7*128 + 104), no wrapper-side padding.
    out_multi = jax.block_until_ready(
        small_dense_phi(x_big, weights, biases, batch_tile=256))
    assert jnp.allclose(out_multi, ref_big, atol=1e-3, rtol=1e-3), \
        f"max abs diff {jnp.max(jnp.abs(out_multi - ref_big))}"

    # 4) bf16 streaming path (halved HBM traffic): x/W bf16, f32 accumulation.
    x_bf = x_big.astype(jnp.bfloat16)
    w_bf = [w.astype(jnp.bfloat16) for w in weights]
    out_bf = jax.block_until_ready(
        small_dense_phi(x_bf, w_bf, biases, batch_tile=256))
    assert out_bf.dtype == jnp.bfloat16
    err = jnp.max(jnp.abs(out_bf.astype(jnp.float32) - ref_big))
    assert err < 5e-2, f"bf16 max abs err {err}"

    print("KERNEL_OK")
</pallas_src>

<mosaic_0001>
module attributes {stable_mosaic.version = 11 : i64} {
  func.func @_mlp_kernel(%arg0: i32, %arg1: memref<16x32xf32, #tpu.memory_space<vmem>>, %arg2: memref<32x64xf32, #tpu.memory_space<vmem>>, %arg3: memref<1x64xf32, #tpu.memory_space<vmem>>, %arg4: memref<64x48xf32, #tpu.memory_space<vmem>>, %arg5: memref<1x48xf32, #tpu.memory_space<vmem>>, %arg6: memref<48x16xf32, #tpu.memory_space<vmem>>, %arg7: memref<1x16xf32, #tpu.memory_space<vmem>>, %arg8: memref<16x16xf32, #tpu.memory_space<vmem>>) attributes {dimension_semantics = [#tpu.dimension_semantics<parallel>], iteration_bounds = array<i64: 1>, scalar_prefetch = 0 : i64, scratch_operands = 0 : i64, tpu.core_type = #tpu.core_type<tc>, window_params = [{transform_indices = @transform_0, window_bounds = array<i64: 16, 32>}, {pipeline_mode = #tpu.pipeline_mode<synchronous>, transform_indices = @transform_1, window_bounds = array<i64: 32, 64>}, {pipeline_mode = #tpu.pipeline_mode<synchronous>, transform_indices = @transform_2, window_bounds = array<i64: 1, 64>}, {pipeline_mode = #tpu.pipeline_mode<synchronous>, transform_indices = @transform_3, window_bounds = array<i64: 64, 48>}, {pipeline_mode = #tpu.pipeline_mode<synchronous>, transform_indices = @transform_4, window_bounds = array<i64: 1, 48>}, {pipeline_mode = #tpu.pipeline_mode<synchronous>, transform_indices = @transform_5, window_bounds = array<i64: 48, 16>}, {pipeline_mode = #tpu.pipeline_mode<synchronous>, transform_indices = @transform_6, window_bounds = array<i64: 1, 16>}, {transform_indices = @transform_7, window_bounds = array<i64: 16, 16>}]} {
    %c0 = arith.constant 0 : index
    %c0_0 = arith.constant 0 : index
    %0 = vector.load %arg2[%c0, %c0_0] : memref<32x64xf32, #tpu.memory_space<vmem>>, vector<32x64xf32>
    %c0_1 = arith.constant 0 : index
    %c0_2 = arith.constant 0 : index
    %1 = vector.load %arg4[%c0_1, %c0_2] : memref<64x48xf32, #tpu.memory_space<vmem>>, vector<64x48xf32>
    %c0_3 = arith.constant 0 : index
    %c0_4 = arith.constant 0 : index
    %2 = vector.load %arg6[%c0_3, %c0_4] : memref<48x16xf32, #tpu.memory_space<vmem>>, vector<48x16xf32>
    %c0_5 = arith.constant 0 : index
    %c0_6 = arith.constant 0 : index
    %3 = vector.load %arg3[%c0_5, %c0_6] : memref<1x64xf32, #tpu.memory_space<vmem>>, vector<1x64xf32>
    %c0_7 = arith.constant 0 : index
    %c0_8 = arith.constant 0 : index
    %4 = vector.load %arg5[%c0_7, %c0_8] : memref<1x48xf32, #tpu.memory_space<vmem>>, vector<1x48xf32>
    %c0_9 = arith.constant 0 : index
    %c0_10 = arith.constant 0 : index
    %5 = vector.load %arg7[%c0_9, %c0_10] : memref<1x16xf32, #tpu.memory_space<vmem>>, vector<1x16xf32>
    %c0_i32 = arith.constant 0 : i32
    %c16_i32 = arith.constant 16 : i32
    %6 = arith.muli %c0_i32, %c16_i32 : i32
    %7 = tpu.assume_multiple %6, 16 : i32
    %8 = arith.index_cast %7 : i32 to index
    %c0_11 = arith.constant 0 : index
    %9 = vector.load %arg1[%8, %c0_11] : memref<16x32xf32, #tpu.memory_space<vmem>>, vector<16x32xf32>
    %cst = arith.constant dense<0.000000e+00> : vector<16x64xf32>
    %10 = tpu.matmul %9, %0, %cst {dimension_numbers = #tpu.dot_dimension_numbers<[1], [0], [0], [1], [0, 0, 1, 1], [], []>} : vector<16x32xf32>, vector<32x64xf32>, vector<16x64xf32> -> vector<16x64xf32>
    %11 = vector.broadcast %3 : vector<1x64xf32> to vector<16x64xf32>
    %12 = arith.addf %10, %11 : vector<16x64xf32>
    %cst_12 = arith.constant 0.000000e+00 : f32
    %13 = vector.broadcast %cst_12 : f32 to vector<16x64xf32>
    %14 = arith.maximumf %12, %13 : vector<16x64xf32>
    %cst_13 = arith.constant dense<0.000000e+00> : vector<16x48xf32>
    %15 = tpu.matmul %14, %1, %cst_13 {dimension_numbers = #tpu.dot_dimension_numbers<[1], [0], [0], [1], [0, 0, 1, 1], [], []>} : vector<16x64xf32>, vector<64x48xf32>, vector<16x48xf32> -> vector<16x48xf32>
    %16 = vector.broadcast %4 : vector<1x48xf32> to vector<16x48xf32>
    %17 = arith.addf %15, %16 : vector<16x48xf32>
    %cst_14 = arith.constant 0.000000e+00 : f32
    %18 = vector.broadcast %cst_14 : f32 to vector<16x48xf32>
    %19 = arith.maximumf %17, %18 : vector<16x48xf32>
    %cst_15 = arith.constant dense<0.000000e+00> : vector<16x16xf32>
    %20 = tpu.matmul %19, %2, %cst_15 {dimension_numbers = #tpu.dot_dimension_numbers<[1], [0], [0], [1], [0, 0, 1, 1], [], []>} : vector<16x48xf32>, vector<48x16xf32>, vector<16x16xf32> -> vector<16x16xf32>
    %21 = vector.broadcast %5 : vector<1x16xf32> to vector<16x16xf32>
    %22 = arith.addf %20, %21 : vector<16x16xf32>
    %23 = arith.index_cast %7 : i32 to index
    %c0_16 = arith.constant 0 : index
    %24 = vector.load %arg8[%23, %c0_16] : memref<16x16xf32, #tpu.memory_space<vmem>>, vector<16x16xf32>
    tpu.vector_store %arg8[%23, %c0_16], %22 {strides = array<i32>} : memref<16x16xf32, #tpu.memory_space<vmem>>, vector<16x16xf32>,
    %c1_i32 = arith.constant 1 : i32
    return
  }
  func.func @transform_0(%arg0: i32) -> (i32, i32) {
    %c0_i32 = arith.constant 0 : i32
    %c0_i32_0 = arith.constant 0 : i32
    return %arg0, %c0_i32 : i32, i32
  }
  func.func @transform_1(%arg0: i32) -> (i32, i32) {
    %c0_i32 = arith.constant 0 : i32
    %c0_i32_0 = arith.constant 0 : i32
    %c0_i32_1 = arith.constant 0 : i32
    return %c0_i32, %c0_i32_0 : i32, i32
  }
  func.func @transform_2(%arg0: i32) -> (i32, i32) {
    %c0_i32 = arith.constant 0 : i32
    %c0_i32_0 = arith.constant 0 : i32
    %c0_i32_1 = arith.constant 0 : i32
    return %c0_i32, %c0_i32_0 : i32, i32
  }
  func.func @transform_3(%arg0: i32) -> (i32, i32) {
    %c0_i32 = arith.constant 0 : i32
    %c0_i32_0 = arith.constant 0 : i32
    %c0_i32_1 = arith.constant 0 : i32
    return %c0_i32, %c0_i32_0 : i32, i32
  }
  func.func @transform_4(%arg0: i32) -> (i32, i32) {
    %c0_i32 = arith.constant 0 : i32
    %c0_i32_0 = arith.constant 0 : i32
    %c0_i32_1 = arith.constant 0 : i32
    return %c0_i32, %c0_i32_0 : i32, i32
  }
  func.func @transform_5(%arg0: i32) -> (i32, i32) {
    %c0_i32 = arith.constant 0 : i32
    %c0_i32_0 = arith.constant 0 : i32
    %c0_i32_1 = arith.constant 0 : i32
    return %c0_i32, %c0_i32_0 : i32, i32
  }
  func.func @transform_6(%arg0: i32) -> (i32, i32) {
    %c0_i32 = arith.constant 0 : i32
    %c0_i32_0 = arith.constant 0 : i32
    %c0_i32_1 = arith.constant 0 : i32
    return %c0_i32, %c0_i32_0 : i32, i32
  }
  func.func @transform_7(%arg0: i32) -> (i32, i32) {
    %c0_i32 = arith.constant 0 : i32
    %c0_i32_0 = arith.constant 0 : i32
    return %arg0, %c0_i32 : i32, i32
  }
}

</mosaic_0001>

<bundles_post_ra>
// kernel: tpu_custom_call.1
= control target key start
LH: loop header
LB: loop body
LE: loop exit
PB: predicated region body
PF: predicated region fallthrough
CT: control target
= control target key end

     0   :  { %vm56_vm0 = vcmask 261120   ;;  %s557_s0 = inlined_call_operand.vmem [shape: f32[16,32], index: 0, kind: input, shape index: {}]   ;;  %s558_s1 = inlined_call_operand.vmem [shape: f32[32,64], index: 1, kind: input, shape index: {}]   ;;  %s559_s2 = inlined_call_operand.vmem [shape: f32[1,64], index: 2, kind: input, shape index: {}]   ;;  %s560_s3 = inlined_call_operand.vmem [shape: f32[64,48], index: 3, kind: input, shape index: {}]   ;;  %s561_s4 = inlined_call_operand.vmem [shape: f32[1,48], index: 4, kind: input, shape index: {}]   ;;  %s562_s5 = inlined_call_operand.vmem [shape: f32[48,16], index: 5, kind: input, shape index: {}]   ;;  %s563_s6 = inlined_call_operand.vmem [shape: f32[1,16], index: 6, kind: input, shape index: {}]   ;;  %s564_s7 = inlined_call_operand.hbm [shape: f32[16,16], index: 7, kind: output, shape index: {}]  }
   0x1   :  { %v30_v0 = vld [vmem:[%s558_s1 + $0x18] sm:$0xff]  ;;  %v29_v1 = vld [vmem:[%s558_s1 + $0x10] sm:$0xff]  ;;  %v48_v2 = vld [vmem:[%s557_s0] sm:$0xff] }
   0x2   :  { %370 = vmatprep.subr.mxu0 %v30_v0  ;;  %v28_v3 = vld [vmem:[%s558_s1 + $0x8] sm:$0xff]  ;;  %378 = vmatprep.mubr.msk.f32.mxu0 %vm56_vm0, %v48_v2  ;;  %v38_v4 = vld [vmem:[%s560_s3 + $0x38] sm:$0xff]  ;;  %v37_v5 = vld [vmem:[%s560_s3 + $0x30] sm:$0xff] }
   0x3   :  { %371 = vmatpush3.msra.mxu0 %v30_v0  ;;  %381 = vmatprep.subr.mxu1 %v38_v4 }
   0x4   :  { %372 = vmatprep.subr.mxu0 %v29_v1 }
   0x5   :  { %12 = vsyncpa [#allocation3], 0  ;;  %373 = vmatpush3.msra.mxu0 %v29_v1  ;;  %v27_v6 = vld [vmem:[%s558_s1] sm:$0xff]  ;;  %382 = vmatpush3.msra.mxu1 %v38_v4  ;;  %v36_v7 = vld [vmem:[%s560_s3 + $0x28] sm:$0xff]  ;;  %vm146_vm1 = vcmask 523264   ;;  %vm236_vm2 = vcmask 392192  }
   0x6   :  { %374 = vmatprep.subr.mxu0 %v28_v3  ;;  %383 = vmatprep.subr.mxu1 %v37_v5  ;;  %v49_v8 = vld [vmem:[%s557_s0 + $0x8] sm:$0xff]  ;;  %v35_v9 = vld [vmem:[%s560_s3 + $0x20] sm:$0xff]  ;;  %v34_v10 = vld [vmem:[%s560_s3 + $0x18] sm:$0xff]  ;;  %vm318_vm3 = vcmask 130048  }
   0x7   :  { %375 = vmatpush3.msra.mxu0 %v28_v3  ;;  %384 = vmatpush3.msra.mxu1 %v37_v5  ;;  %v33_v11 = vld [vmem:[%s560_s3 + $0x10] sm:$0xff]  ;;  %v32_v12 = vld [vmem:[%s560_s3 + $0x8] sm:$0xff]  ;;  %v31_v13 = vld [vmem:[%s560_s3] sm:$0xff] }
   0x8   :  { %376 = vmatprep.subr.mxu0 %v27_v6  ;;  %385 = vmatprep.subr.mxu1 %v36_v7  ;;  %v44_v14 = vld [vmem:[%s562_s5 + $0x28] sm:$0xff]  ;;  %v43_v15 = vld [vmem:[%s562_s5 + $0x20] sm:$0xff]  ;;  %v42_v23 = vld [vmem:[%s562_s5 + $0x18] sm:$0xff] }
   0x9   :  { %377 = vmatpush3.msra.mxu0 %v27_v6  ;;  %386 = vmatpush3.msra.mxu1 %v36_v7  ;;  %v337_v16 = vld [vmem:[%s559_s2] ss:$0 sm:$0xff]  ;;  %v41_v24 = vld [vmem:[%s562_s5 + $0x10] sm:$0xff]  ;;  %v40_v25 = vld [vmem:[%s562_s5 + $0x8] sm:$0xff] }
   0xa   :  { %379 = vmatmul.mubr.msk.f32.vlgmr.msra.gmra.mxu0 %vm56_vm0, %v49_v8  ;;  %387 = vmatprep.subr.mxu1 %v35_v9  ;;  %v39_v26 = vld [vmem:[%s562_s5] sm:$0xff]  ;;  %s440_s5 = smov [#allocation2]  }
   0xb   :  { %388 = vmatpush3.msra.mxu1 %v35_v9  ;;  %400 = vmatprep.subr.mxu0 %v44_v14  ;;  %v340_v27 = vld [vmem:[%s561_s4] ss:$0 sm:$0xff]  ;;  %s326_s20 = sshll.u32 %s440_s5, 4  ;;  %s327_s20 = int_to_ptr.vmem [resolvable:$true] %s326_s20 }
   0xc   :  { %389 = vmatprep.subr.mxu1 %v34_v10  ;;  %401 = vmatpush3.msra.mxu0 %v44_v14  ;;  %v343_v34 = vld [vmem:[%s563_s6] ss:$0 sm:$0xff]  ;;  %s418_s4 = scalar_lea.vmem %s327_s20, 256  ;;  %p423_p1 = scmp.lt.s32.totalorder %s327_s20, %s327_s20 }
   0xd   :  { %390 = vmatpush3.msra.mxu1 %v34_v10  ;;  %402 = vmatprep.subr.mxu0 %v43_v15  ;;  %p419_p0 = scmp.ne.s32.totalorder %s327_s20, %s418_s4  ;;  %p424_p2 = scmp.lt.s32.totalorder %s418_s4, %s418_s4 }
   0xe   :  { %391 = vmatprep.subr.mxu1 %v33_v11  ;;  %403 = vmatpush3.msra.mxu0 %v43_v15 }
   0xf   :  { %392 = vmatpush3.msra.mxu1 %v33_v11  ;;  %404 = vmatprep.subr.mxu0 %v42_v23  ;;  %p425_p3 = por %p424_p2, %p423_p1 }
  0x10   :  { %393 = vmatprep.subr.mxu1 %v32_v12  ;;  %405 = vmatpush3.msra.mxu0 %v42_v23 }
  0x11   :  { %394 = vmatpush3.msra.mxu1 %v32_v12  ;;  %406 = vmatprep.subr.mxu0 %v41_v24  ;;  %p426_p4 = pnand %p425_p3, %p419_p0 }
  0x12   :  { %395 = vmatprep.subr.mxu1 %v31_v13  ;;  %407 = vmatpush3.msra.mxu0 %v41_v24 }
  0x13   :  { %396 = vmatpush3.msra.mxu1 %v31_v13  ;;  %408 = vmatprep.subr.mxu0 %v40_v25 }
  0x14   :  { %409 = vmatpush3.msra.mxu0 %v40_v25 }
  0x15   :  { %410 = vmatprep.subr.mxu0 %v39_v26 }
  0x16   :  { %411 = vmatpush3.msra.mxu0 %v39_v26 }
  0xca   :  { %v380_v17 = vpop.f32.mrf.mxu0 }
  0xcb   :  { %v135_v18 = vadd.f32 %v380_v17, %v337_v16 }
  0xcc   :  { %v129_v19 = vpop.f32.mrf.mxu0 }
  0xcd   :  { %v130_v20 = vadd.f32 %v337_v16, %v129_v19  ;;  %v139_v22 = vmax.f32 %v135_v18, 0.0 }
  0xcf   :  { %v138_v21 = vmax.f32 %v130_v20, 0.0 }
  0xd1   :  { %397 = vmatprep.mubr.msk.f32.mxu1 %vm146_vm1, %v138_v21 }
  0xd2   :  { %398 = vmatmul.mubr.msk.f32.vlgmr.msra.gmra.mxu1 %vm146_vm1, %v139_v22 }
 0x192   :  { %v399_v28 = vpop.f32.mrf.mxu1 }
 0x193   :  { %v225_v29 = vadd.f32 %v399_v28, %v340_v27 }
 0x194   :  { %v219_v30 = vpop.f32.mrf.mxu1 }
 0x195   :  { %v220_v31 = vadd.f32 %v340_v27, %v219_v30  ;;  %v229_v33 = vmax.f32 %v225_v29, 0.0 }
 0x197   :  { %v228_v32 = vmax.f32 %v220_v31, 0.0 }
 0x199   :  { %412 = vmatprep.mubr.msk.f32.mxu0 %vm236_vm2, %v228_v32 }
 0x19a   :  { %413 = vmatmul.mubr.msk.f32.vlgmr.msra.gmra.mxu0 %vm236_vm2, %v229_v33 }
 0x25a   :  { %v414_v35 = vpop.f32.mrf.mxu0 }
 0x25b   :  { %v315_v36 = vadd.f32 %v414_v35, %v343_v34 }
 0x25c   :  { %v309_v37 = vpop.f32.mrf.mxu0 }
 0x25d   :  { %320 = vst.msk [vmem:[#allocation2 + $0x8] sm:$0xff] %vm318_vm3, %v315_v36  ;;  %v310_v38 = vadd.f32 %v343_v34, %v309_v37 }
 0x25f   :  { %319 = vst.msk [vmem:[#allocation2] sm:$0xff] %vm318_vm3, %v310_v38 }
 0x260   :  { %429 = shalt.err (!%p426_p4)
}
 0x261   :  { %s441_s1 = smov 128   ;;  %s442_s21 = smov 8  }
 0x262   :  { %332 = dma.vmem_to_hbm [thread:$0]  %s327_s20, 256, %s564_s7, [#allocation3], %s441_s1, %s441_s1, %s442_s21  }
 0x263   :  { %438 = dma.done.wait [#allocation3], 256  }
 0x264   :  { %439 = vsyncadd [#allocation3], 4294967040 }
 0x265   :  { %336 = vsyncpa [#allocation3], 1 }

</bundles_post_ra>
